<compile_context>
chip_gen: v7x
topology: tpu7x:2x2x1
jax: 0.10.0
libtpu: 0.0.40
codegen_flags: <defaults>
</compile_context>

<pallas_src>
import functools

import jax
import jax.numpy as jnp
from jax.experimental import pallas as pl
from jax.experimental.pallas import tpu as pltpu


def _normalize_kernel(scale_ref, shift_ref, img_ref, out_ref):
    # scale_ref / shift_ref : (tr, 1) float32 in VMEM  (per-row affine params)
    # img_ref               : (tr, tl) native-dtype tile in VMEM
    # out_ref               : (tr, tl) output-dtype tile in VMEM
    x = img_ref[...].astype(jnp.float32)             # in-kernel cast (uint8/bf16/f32 -> f32)
    y = x * scale_ref[...] + shift_ref[...]          # (img - mean)/std == img*(1/std) + (-mean/std)
    out_ref[...] = y.astype(out_ref.dtype)


def _choose_blocks(R, L, target_bytes=2 * 1024 * 1024):
    """Pick a (rows, lanes) block: lane-dense, sublane-aligned, ~target_bytes at f32."""
    bpe = 4  # size blocks against the f32 compute/output path
    if L <= 128 or 8 * L * bpe <= target_bytes:
        tl = L                                                       # full lane extent (always legal)
    else:
        tl = max(128, ((target_bytes // (8 * bpe)) // 128) * 128)    # multiple of 128
    rows_budget = max(8, target_bytes // (tl * bpe))
    if R <= rows_budget:
        tr = R                                                       # full sublane extent (always legal)
    else:
        tr = (rows_budget // 8) * 8                                  # multiple of 8
    return tr, tl


@functools.partial(jax.jit, static_argnames=("mean", "std", "inplace"))
def normalize_pallas(img: jax.Array, mean: tuple, std: tuple, inplace: bool = False):
    """(img - mean) / std per channel, NCHW layout. Returns the normalized image."""
    N, C, H, W = img.shape
    out_dtype = img.dtype if jnp.issubdtype(img.dtype, jnp.floating) else jnp.float32

    mean_arr = jnp.asarray(mean, dtype=jnp.float32)
    std_arr = jnp.asarray(std, dtype=jnp.float32)
    assert mean_arr.shape == (C,) and std_arr.shape == (C,)

    # Fold mean/std into a per-channel affine, replicated per image-channel row.
    scale_c = 1.0 / std_arr                      # (C,)
    shift_c = -mean_arr / std_arr                # (C,)
    R, L = N * C, H * W
    scale_rows = jnp.tile(scale_c, N).reshape(R, 1)   # row r <-> channel r % C
    shift_rows = jnp.tile(shift_c, N).reshape(R, 1)

    img2d = img.reshape(R, L)                    # free reshape of contiguous NCHW, native dtype

    tr, tl = _choose_blocks(R, L)
    grid = (pl.cdiv(R, tr), pl.cdiv(L, tl))

    # Reuse the image HBM buffer for the output when the caller allows it and dtypes match.
    aliases = {2: 0} if (inplace and img2d.dtype == out_dtype) else {}

    out2d = pl.pallas_call(
        _normalize_kernel,
        out_shape=jax.ShapeDtypeStruct((R, L), out_dtype),
        grid_spec=pl.GridSpec(
            grid=grid,
            in_specs=[
                pl.BlockSpec((tr, 1), lambda i, j: (i, 0)),    # scale (per-row, constant along j)
                pl.BlockSpec((tr, 1), lambda i, j: (i, 0)),    # shift (per-row, constant along j)
                pl.BlockSpec((tr, tl), lambda i, j: (i, j)),   # img tile
            ],
            out_specs=pl.BlockSpec((tr, tl), lambda i, j: (i, j)),
        ),
        compiler_params=pltpu.CompilerParams(
            dimension_semantics=("parallel", "parallel"),
        ),
        input_output_aliases=aliases,
    )(scale_rows, shift_rows, img2d)

    return out2d.reshape(N, C, H, W)


class NormalizePallas:
    """Mirror of yolo Normalize: forward(img, bboxes) -> (normalized_img, bboxes)."""

    def __init__(self, mean: tuple, std: tuple, inplace: bool = False):
        self.mean = tuple(float(m) for m in mean)
        self.std = tuple(float(s) for s in std)
        self.inplace = bool(inplace)

    def __call__(self, img, bboxes):
        return normalize_pallas(img, self.mean, self.std, self.inplace), bboxes


if __name__ == "__main__":
    key = jax.random.PRNGKey(0)
    k_img, k_box = jax.random.split(key)

    N, C, H, W = 2, 3, 16, 16
    img = jax.random.uniform(k_img, (N, C, H, W), dtype=jnp.float32)
    bboxes = jax.random.uniform(k_box, (5, 4), dtype=jnp.float32)

    mean = (0.485, 0.456, 0.406)
    std = (0.229, 0.224, 0.225)

    ref = (img - jnp.asarray(mean).reshape(1, C, 1, 1)) / jnp.asarray(std).reshape(1, C, 1, 1)

    # f32 path
    mod = NormalizePallas(mean, std)
    out_img, out_boxes = mod(img, bboxes)
    jax.block_until_ready(out_img)
    jax.block_until_ready(out_boxes)
    assert out_img.dtype == jnp.float32
    assert jnp.allclose(out_img, ref, atol=1e-5, rtol=1e-5)
    assert jnp.array_equal(out_boxes, bboxes)

    # inplace path (output aliases the image buffer), same numerics
    out_inpl, _ = NormalizePallas(mean, std, inplace=True)(img, bboxes)
    jax.block_until_ready(out_inpl)
    assert jnp.allclose(out_inpl, ref, atol=1e-5, rtol=1e-5)

    # native bf16 input: cast happens inside the kernel, bf16 output, no wrapper-side f32 pass
    img_bf16 = img.astype(jnp.bfloat16)
    out_bf16, _ = NormalizePallas(mean, std)(img_bf16, bboxes)
    jax.block_until_ready(out_bf16)
    ref_bf16 = (img_bf16.astype(jnp.float32) - jnp.asarray(mean).reshape(1, C, 1, 1)) / jnp.asarray(
        std
    ).reshape(1, C, 1, 1)
    assert out_bf16.dtype == jnp.bfloat16
    assert jnp.allclose(out_bf16.astype(jnp.float32), ref_bf16, atol=3e-2, rtol=3e-2)

    # uint8 input (common for image pipelines): f32 output, quarter the read bytes
    img_u8 = (img * 255.0).astype(jnp.uint8)
    out_u8, _ = NormalizePallas(mean, std)(img_u8, bboxes)
    jax.block_until_ready(out_u8)
    ref_u8 = (img_u8.astype(jnp.float32) - jnp.asarray(mean).reshape(1, C, 1, 1)) / jnp.asarray(
        std
    ).reshape(1, C, 1, 1)
    assert out_u8.dtype == jnp.float32
    assert jnp.allclose(out_u8, ref_u8, atol=1e-4, rtol=1e-4)

    print("KERNEL_OK")
</pallas_src>

<mosaic_0001>
module attributes {stable_mosaic.version = 11 : i64} {
  func.func @_normalize_kernel(%arg0: i32, %arg1: i32, %arg2: memref<6x1xf32, #tpu.memory_space<vmem>>, %arg3: memref<6x1xf32, #tpu.memory_space<vmem>>, %arg4: memref<6x256xf32, #tpu.memory_space<vmem>>, %arg5: memref<6x256xf32, #tpu.memory_space<vmem>>) attributes {dimension_semantics = [#tpu.dimension_semantics<parallel>, #tpu.dimension_semantics<parallel>], iteration_bounds = array<i64: 1, 1>, scalar_prefetch = 0 : i64, scratch_operands = 0 : i64, tpu.core_type = #tpu.core_type<tc>, window_params = [{transform_indices = @transform_0, window_bounds = array<i64: 6, 1>}, {transform_indices = @transform_1, window_bounds = array<i64: 6, 1>}, {transform_indices = @transform_2, window_bounds = array<i64: 6, 256>}, {transform_indices = @transform_3, window_bounds = array<i64: 6, 256>}]} {
    %c0 = arith.constant 0 : index
    %c0_0 = arith.constant 0 : index
    %0 = vector.load %arg4[%c0, %c0_0] : memref<6x256xf32, #tpu.memory_space<vmem>>, vector<6x256xf32>
    %c0_1 = arith.constant 0 : index
    %c0_2 = arith.constant 0 : index
    %1 = vector.load %arg2[%c0_1, %c0_2] : memref<6x1xf32, #tpu.memory_space<vmem>>, vector<6x1xf32>
    %2 = vector.broadcast %1 : vector<6x1xf32> to vector<6x256xf32>
    %3 = arith.mulf %0, %2 : vector<6x256xf32>
    %c0_3 = arith.constant 0 : index
    %c0_4 = arith.constant 0 : index
    %4 = vector.load %arg3[%c0_3, %c0_4] : memref<6x1xf32, #tpu.memory_space<vmem>>, vector<6x1xf32>
    %5 = vector.broadcast %4 : vector<6x1xf32> to vector<6x256xf32>
    %6 = arith.addf %3, %5 : vector<6x256xf32>
    %c0_5 = arith.constant 0 : index
    %c0_6 = arith.constant 0 : index
    %7 = vector.load %arg5[%c0_5, %c0_6] : memref<6x256xf32, #tpu.memory_space<vmem>>, vector<6x256xf32>
    tpu.vector_store %arg5[%c0_5, %c0_6], %6 {strides = array<i32>} : memref<6x256xf32, #tpu.memory_space<vmem>>, vector<6x256xf32>,
    return
  }
  func.func @transform_0(%arg0: i32, %arg1: i32) -> (i32, i32) {
    %c0_i32 = arith.constant 0 : i32
    %c0_i32_0 = arith.constant 0 : i32
    return %arg0, %c0_i32 : i32, i32
  }
  func.func @transform_1(%arg0: i32, %arg1: i32) -> (i32, i32) {
    %c0_i32 = arith.constant 0 : i32
    %c0_i32_0 = arith.constant 0 : i32
    return %arg0, %c0_i32 : i32, i32
  }
  func.func @transform_2(%arg0: i32, %arg1: i32) -> (i32, i32) {
    %c0_i32 = arith.constant 0 : i32
    return %arg0, %arg1 : i32, i32
  }
  func.func @transform_3(%arg0: i32, %arg1: i32) -> (i32, i32) {
    %c0_i32 = arith.constant 0 : i32
    return %arg0, %arg1 : i32, i32
  }
}

</mosaic_0001>

<bundles_post_ra>
// kernel: tile.1
= control target key start
LH: loop header
LB: loop body
LE: loop exit
PB: predicated region body
PF: predicated region fallthrough
CT: control target
= control target key end

     0   :  { %vm7_vm0 = vcmask 7168   ;;  %s26_s10 = smov 126   ;;  %s49_s0 = inlined_call_operand.vmem [shape: f32[2,3], index: 0, kind: input, shape index: {}]   ;;  %s50_s1 = inlined_call_operand.vmem [shape: f32[6,1], index: 1, kind: output, shape index: {}]  }
   0x1   :  { %v4_v0 = vld [vmem:[%s49_s0] sm:$0x3]  ;;  %s25_s0 = smov 127  }
   0x2   :  { %5 = vst [vmem:[#allocation0] sm:$0x3] %v4_v0 }
   0x9   :  { %v9_v1 = vld [vmem:[#allocation0] sm:$0x3]  }
   0xa   :  { %v6_v2 = vld [vmem:[#allocation0] sm:$0x3]   ;;  %10 = vrot.lane.b32.xlu0 %v9_v1, %s25_s0 }
   0xb   :  { %8 = vst.msk [vmem:[%s50_s1] ss:$3 sm:$0x3] %vm7_vm0, %v6_v2   ;;  %v15_v3 = vld [vmem:[#allocation0] sm:$0x3]  }
   0xe   :  { %16 = vrot.lane.b32.xlu0 %v15_v3, %s26_s10 }
  0x7c   :  { %v11_v4 = vpop.permute.xlu0 %10  }
  0x7d   :  { %21 = vst.msk [vmem:[%s50_s1 + $0x1] ss:$3 sm:$0x3] %vm7_vm0, %v11_v4  }
  0x80   :  { %v17_v5 = vpop.permute.xlu0 %16  }
  0x81   :  { %22 = vst.msk [vmem:[%s50_s1 + $0x2] ss:$3 sm:$0x3] %vm7_vm0, %v17_v5  }

// kernel: tile.14
= control target key start
LH: loop header
LB: loop body
LE: loop exit
PB: predicated region body
PF: predicated region fallthrough
CT: control target
= control target key end

     0   :  { %s22_s0 = inlined_call_operand.vmem [shape: f32[3], index: 0, kind: input, shape index: {}]   ;;  %s23_s1 = inlined_call_operand.vmem [shape: f32[2,3], index: 1, kind: output, shape index: {}]  }
   0x1   :  { %v4_v0 = vld [vmem:[%s22_s0] ss:$0 sm:$0xff] }
   0x2   :  { %5 = vst [vmem:[%s23_s1] sm:$0x3] %v4_v0 }

// kernel: normalize_pallas.1
= control target key start
LH: loop header
LB: loop body
LE: loop exit
PB: predicated region body
PF: predicated region fallthrough
CT: control target
= control target key end

     0   :  { %v40_v0 = vmov 0   ;;  %s79_s0 = inlined_call_operand.vmem [shape: f32[6,1], index: 0, kind: input, shape index: {}]   ;;  %s80_s1 = inlined_call_operand.vmem [shape: f32[6,1], index: 1, kind: input, shape index: {}]   ;;  %s81_s2 = inlined_call_operand.vmem [shape: f32[6,256], index: 2, kind: input, shape index: {}]   ;;  %s82_s3 = inlined_call_operand.vmem [shape: f32[6,256], index: 3, kind: output, shape index: {}]  }
   0x1   :  { %39 = vset.pattern.permute.xlu0 %v40_v0  ;;  %v16_v1 = vld [vmem:[%s79_s0] sm:$0x3f]  ;;  %v15_v4 = vld [vmem:[%s81_s2 + $0x8] sm:$0x3f] }
   0x2   :  { %19 = vperm.xlu0 %39, %v16_v1   ;;  %v24_v2 = vld [vmem:[%s80_s1] sm:$0x3f] }
   0x3   :  { %v14_v3 = vld [vmem:[%s81_s2] sm:$0x3f] }
   0x6   :  { %27 = vperm.xlu0 %39, %v24_v2  }
  0x81   :  { %v20_v5 = vpop.permute.xlu0 %19 }
  0x82   :  { %v22_v6 = vmul.f32 %v20_v5, %v14_v3  ;;  %v23_v7 = vmul.f32 %v20_v5, %v15_v4 }
  0x85   :  { %v28_v8 = vpop.permute.xlu0 %27 }
  0x86   :  { %v30_v9 = vadd.f32 %v28_v8, %v22_v6  ;;  %v31_v10 = vadd.f32 %v28_v8, %v23_v7 }
  0x88   :  { %32 = vst [vmem:[%s82_s3] sm:$0x3f] %v30_v9  ;;  %33 = vst [vmem:[%s82_s3 + $0x8] sm:$0x3f] %v31_v10 }

</bundles_post_ra>
